<compile_context>
chip_gen: v7x
topology: tpu7x:2x2x1
jax: 0.10.0
libtpu: 0.0.40
codegen_flags: <defaults>
</compile_context>

<pallas_src>
import jax
import jax.numpy as jnp
from jax.experimental import pallas as pl
from jax.experimental.pallas import tpu as pltpu


def _h_swish_kernel(x_ref, o_ref):
    x = x_ref[...]
    # h_sigmoid(x) = relu6(x + 3) / 6 ; h_swish(x) = x * h_sigmoid(x)
    hs = jnp.clip(x + 3.0, 0.0, 6.0) * (1.0 / 6.0)
    o_ref[...] = (x * hs).astype(o_ref.dtype)


def h_swish(x: jax.Array, *, target_block_bytes: int = 2 * 1024 * 1024) -> jax.Array:
    """Elementwise hard-swish. Accepts any shape (NCHW expected)."""
    orig_shape = x.shape
    dtype = x.dtype
    n = x.size
    if n == 0:
        return x

    itemsize = jnp.dtype(dtype).itemsize

    # Widest lane-dense last dim that divides n exactly and still leaves >= 8 rows.
    lanes = None
    for cand in (2048, 1024, 512, 256, 128):
        if n % cand == 0 and n // cand >= 8:
            lanes = cand
            break
    if lanes is None:
        lanes = 128  # tiny or non-128-aligned arrays

    x_flat = jnp.ravel(x)
    padded = n % lanes != 0
    if padded:
        # Only hit when n is not a multiple of 128: pad just the tail row.
        n_pad = pl.cdiv(n, lanes) * lanes
        x_flat = jnp.pad(x_flat, (0, n_pad - n))
    else:
        n_pad = n

    rows = n_pad // lanes
    x2d = x_flat.reshape(rows, lanes)

    # ~target_block_bytes per block; sublane dim a multiple of 32 (covers f32/bf16
    # packing) unless the whole array is smaller than one block.
    target_rows = max(1, target_block_bytes // (lanes * itemsize))
    if target_rows >= rows:
        tile_rows = rows  # single block == full array (shape constraint satisfied)
    else:
        tile_rows = max(32, (target_rows // 32) * 32)
        tile_rows = min(tile_rows, rows)

    grid = (pl.cdiv(rows, tile_rows),)

    out2d = pl.pallas_call(
        _h_swish_kernel,
        out_shape=jax.ShapeDtypeStruct((rows, lanes), dtype),
        grid_spec=pltpu.PrefetchScalarGridSpec(
            num_scalar_prefetch=0,
            grid=grid,
            in_specs=[pl.BlockSpec((tile_rows, lanes), lambda i: (i, 0))],
            out_specs=pl.BlockSpec((tile_rows, lanes), lambda i: (i, 0)),
        ),
        compiler_params=pltpu.CompilerParams(
            dimension_semantics=("parallel",),
        ),
    )(x2d)

    if padded:
        out = out2d.reshape(-1)[:n].reshape(orig_shape)
    else:
        out = out2d.reshape(orig_shape)
    return out


def _h_swish_ref(x):
    return x * (jnp.clip(x + 3.0, 0.0, 6.0) / 6.0)


if __name__ == "__main__":
    key = jax.random.PRNGKey(0)
    # NCHW, same convention as PyTorch: batch=2, channels=4, H=W=16
    x = jax.random.normal(key, (2, 4, 16, 16), dtype=jnp.float32) * 4.0

    y = h_swish(x)
    y = jax.block_until_ready(y)

    y_ref = _h_swish_ref(x)
    assert y.shape == x.shape and y.dtype == x.dtype
    assert jnp.allclose(y, y_ref, atol=1e-6, rtol=1e-6), "mismatch vs reference"
    print("KERNEL_OK")
</pallas_src>

<mosaic_0001>
module attributes {stable_mosaic.version = 11 : i64} {
  func.func @_h_swish_kernel(%arg0: i32, %arg1: memref<8x256xf32, #tpu.memory_space<vmem>>, %arg2: memref<8x256xf32, #tpu.memory_space<vmem>>) attributes {dimension_semantics = [#tpu.dimension_semantics<parallel>], iteration_bounds = array<i64: 1>, scalar_prefetch = 0 : i64, scratch_operands = 0 : i64, tpu.core_type = #tpu.core_type<tc>, window_params = [{transform_indices = @transform_0, window_bounds = array<i64: 8, 256>}, {transform_indices = @transform_1, window_bounds = array<i64: 8, 256>}]} {
    %c0 = arith.constant 0 : index
    %c0_0 = arith.constant 0 : index
    %0 = vector.load %arg1[%c0, %c0_0] : memref<8x256xf32, #tpu.memory_space<vmem>>, vector<8x256xf32>
    %cst = arith.constant 3.000000e+00 : f32
    %1 = vector.broadcast %cst : f32 to vector<8x256xf32>
    %2 = arith.addf %0, %1 : vector<8x256xf32>
    %cst_1 = arith.constant 0.000000e+00 : f32
    %cst_2 = arith.constant 6.000000e+00 : f32
    %3 = vector.broadcast %cst_1 : f32 to vector<8x256xf32>
    %4 = arith.maximumf %3, %2 : vector<8x256xf32>
    %5 = vector.broadcast %cst_2 : f32 to vector<8x256xf32>
    %6 = arith.minimumf %5, %4 : vector<8x256xf32>
    %cst_3 = arith.constant 0.166666672 : f32
    %7 = vector.broadcast %cst_3 : f32 to vector<8x256xf32>
    %8 = arith.mulf %6, %7 : vector<8x256xf32>
    %9 = arith.mulf %0, %8 : vector<8x256xf32>
    %c0_4 = arith.constant 0 : index
    %c0_5 = arith.constant 0 : index
    %10 = vector.load %arg2[%c0_4, %c0_5] : memref<8x256xf32, #tpu.memory_space<vmem>>, vector<8x256xf32>
    tpu.vector_store %arg2[%c0_4, %c0_5], %9 {strides = array<i32>} : memref<8x256xf32, #tpu.memory_space<vmem>>, vector<8x256xf32>,
    return
  }
  func.func @transform_0(%arg0: i32) -> (i32, i32) {
    %c0_i32 = arith.constant 0 : i32
    %c0_i32_0 = arith.constant 0 : i32
    return %arg0, %c0_i32 : i32, i32
  }
  func.func @transform_1(%arg0: i32) -> (i32, i32) {
    %c0_i32 = arith.constant 0 : i32
    %c0_i32_0 = arith.constant 0 : i32
    return %arg0, %c0_i32 : i32, i32
  }
}

</mosaic_0001>

<bundles_post_ra>
// kernel: tpu_custom_call.1
= control target key start
LH: loop header
LB: loop body
LE: loop exit
PB: predicated region body
PF: predicated region fallthrough
CT: control target
= control target key end

     0   :  { %6 = vsyncpa [#allocation3], 0  ;;  %s136_s0 = inlined_call_operand.hbm [shape: f32[8,256], index: 0, kind: input, shape index: {}]   ;;  %s137_s1 = inlined_call_operand.hbm [shape: f32[8,256], index: 1, kind: output, shape index: {}]  }
   0x1   :  { %7 = vsyncpa [#allocation4], 0  ;;  %s100_s6 = smov [#allocation2]   ;;  %s52_s10 = scalar_lea.hbm %s136_s0, 256 }
   0x2   :  { %s14_s7 = sshll.u32 %s100_s6, 4  ;;  %p53_p0 = scmp.ne.s32.totalorder %s136_s0, %s52_s10  ;;  %s15_s7 = int_to_ptr.vmem [resolvable:$true] %s14_s7 }
   0x3   :  { %p56_p1 = scmp.lt.u32.totalorder %s52_s10, %s136_s0 }
   0x5   :  { %p58_p2 = pnand %p56_p1, %p53_p0 }
   0x7   :  { %61 = shalt.err (!%p58_p2)
}
   0x8   :  { %s62_s15 = scalar_lea.vmem %s15_s7, 256  ;;  %p67_p4 = scmp.lt.s32.totalorder %s15_s7, %s15_s7 }
   0x9   :  { %p63_p3 = scmp.ne.s32.totalorder %s15_s7, %s62_s15  ;;  %p68_p5 = scmp.lt.s32.totalorder %s62_s15, %s62_s15 }
   0xb   :  { %p69_p6 = por %p68_p5, %p67_p4 }
   0xd   :  { %p70_p7 = pnand %p69_p6, %p63_p3 }
   0xf   :  { %73 = shalt.err (!%p70_p7)
}
  0x10   :  { %17 = dma.hbm_to_vmem [thread:$0]  %s136_s0, 256, %s15_s7, [#allocation3]  }
  0x11   :  { %96 = dma.done.wait [#allocation3], 256  }
  0x12   :  { %97 = vsyncadd [#allocation3], 4294967040  ;;  %v21_v0 = vld [vmem:[#allocation2] sm:$0xff]  ;;  %v22_v1 = vld [vmem:[#allocation2 + $0x8] sm:$0xff]  ;;  %s101_s18 = smov [#allocation5]  }
  0x13   :  { %v23_v2 = vadd.f32 3.0, %v21_v0  ;;  %v24_v3 = vadd.f32 3.0, %v22_v1  ;;  %s41_s19 = sshll.u32 %s101_s18, 4  ;;  %s42_s19 = int_to_ptr.vmem [resolvable:$true] %s41_s19 }
  0x14   :  { %s74_s0 = scalar_lea.vmem %s42_s19, 256  ;;  %p79_p9 = scmp.lt.s32.totalorder %s42_s19, %s42_s19 }
  0x15   :  { %v25_v4 = vmax.f32 %v23_v2, 0.0  ;;  %v26_v5 = vmax.f32 %v24_v3, 0.0  ;;  %p75_p8 = scmp.ne.s32.totalorder %s42_s19, %s74_s0  ;;  %p80_p10 = scmp.lt.s32.totalorder %s74_s0, %s74_s0 }
  0x17   :  { %v27_v6 = vmin.f32 %v25_v4, 6.0  ;;  %v28_v7 = vmin.f32 %v26_v5, 6.0  ;;  %p81_p11 = por %p80_p10, %p79_p9 }
  0x19   :  { %v29_v8 = vmul.f32 0.16666667, %v27_v6  ;;  %v30_v9 = vmul.f32 0.16666667, %v28_v7  ;;  %p82_p12 = pnand %p81_p11, %p75_p8 }
  0x1b   :  { %v31_v10 = vmul.f32 %v29_v8, %v21_v0  ;;  %v32_v11 = vmul.f32 %v30_v9, %v22_v1 }
  0x1d   :  { %33 = vst [vmem:[#allocation5] sm:$0xff] %v31_v10  ;;  %34 = vst [vmem:[#allocation5 + $0x8] sm:$0xff] %v32_v11 }
  0x1e   :  { %85 = shalt.err (!%p82_p12)
}
  0x1f   :  { %s86_s22 = scalar_lea.hbm %s137_s1, 256 }
  0x20   :  { %p87_p13 = scmp.ne.s32.totalorder %s137_s1, %s86_s22  ;;  %p90_p0 = scmp.lt.u32.totalorder %s86_s22, %s137_s1 }
  0x22   :  { %p92_p1 = pnand %p90_p0, %p87_p13 }
  0x24   :  { %95 = shalt.err (!%p92_p1)
}
  0x25   :  { %44 = dma.vmem_to_hbm [thread:$0]  %s42_s19, 256, %s137_s1, [#allocation4]  }
  0x26   :  { %98 = dma.done.wait [#allocation4], 256  }
  0x27   :  { %99 = vsyncadd [#allocation4], 4294967040 }
  0x28   :  { %48 = vsyncpa [#allocation3], 1 }
  0x29   :  { %49 = vsyncpa [#allocation4], 1 }

</bundles_post_ra>
